<compile_context>
chip_gen: v5e
topology: v5e:2x2
jax: 0.10.0
libtpu: 0.0.40
codegen_flags: <defaults>
</compile_context>

<pallas_src>
import jax
import jax.numpy as jnp
from jax.experimental import pallas as pl
from jax.experimental.pallas import tpu as pltpu


def _drs_kernel(d_ref, x_ref, o_ref):
    delta = d_ref[0]                                  # SMEM scalar (f32)
    x = x_ref[...]                                    # (row_blk, hw_p)
    x = jnp.maximum(x, 0.0)                           # ReLU
    x_max = jnp.max(x, axis=-1, keepdims=True)        # per-row spatial max
    thr = (x_max.astype(jnp.float32) * delta).astype(x.dtype)
    o_ref[...] = jnp.minimum(x, thr)                  # suppressor


def _pick_row_block(rows, hw_p, itemsize):
    """Row block targeting ~4 MiB/tile, multiple of the sublane size,
    capped so the grid has >=2 steps when possible (v7x has 2 TCs)."""
    sub = {4: 8, 2: 16, 1: 32}.get(itemsize, 8)       # min sublane tile
    target_bytes = 4 << 20                            # ~4 MiB per input tile
    blk = max(sub, (target_bytes // (hw_p * itemsize)) // sub * sub)
    half = -(-rows // 2)                              # ceil(rows / 2)
    half = (half // sub) * sub if half >= sub else rows
    blk = min(blk, half)
    if blk >= rows:
        return rows                                   # one full block
    return blk                                        # multiple of `sub`


def drs(x, delta):
    """x: (B, C, H, W). Returns array of same shape/dtype."""
    b, c, h, w = x.shape
    rows = b * c
    hw = h * w

    # Lane-dense layout: pad H*W up to a multiple of 128 with zeros.
    # Safe for the max: post-ReLU values are >= 0, so zero padding never
    # changes the per-row maximum.
    hw_p = max(128, ((hw + 127) // 128) * 128)
    x2 = x.reshape(rows, hw)
    if hw_p != hw:
        x2 = jnp.pad(x2, ((0, 0), (0, hw_p - hw)))

    itemsize = jnp.dtype(x.dtype).itemsize
    row_blk = _pick_row_block(rows, hw_p, itemsize)
    grid = (pl.cdiv(rows, row_blk),)                  # ragged last block OK

    # Double-buffered input + output tiles, with slack; cap for v7x's 64 MiB.
    block_bytes = row_blk * hw_p * itemsize
    vmem_limit = int(min(48 << 20, max(32 << 20, 4 * block_bytes + (4 << 20))))

    # TODO(synk): for huge H*W where even 8 rows exceed the VMEM budget, add a
    # second grid axis over HW with a two-pass (max, then suppress) scheme.

    delta_arr = jnp.asarray([delta], dtype=jnp.float32)

    out2 = pl.pallas_call(
        _drs_kernel,
        out_shape=jax.ShapeDtypeStruct((rows, hw_p), x2.dtype),
        grid_spec=pltpu.PrefetchScalarGridSpec(
            num_scalar_prefetch=0,
            grid=grid,
            in_specs=[
                pl.BlockSpec(memory_space=pltpu.MemorySpace.SMEM),  # delta
                pl.BlockSpec((row_blk, hw_p), lambda i: (i, 0)),    # x
            ],
            out_specs=pl.BlockSpec((row_blk, hw_p), lambda i: (i, 0)),
        ),
        compiler_params=pltpu.CompilerParams(
            dimension_semantics=("parallel",),
            vmem_limit_bytes=vmem_limit,
        ),
    )(delta_arr, x2)

    if hw_p != hw:
        out2 = out2[:, :hw]
    return out2.reshape(b, c, h, w)


def drs_ref(x, delta):
    x = jnp.maximum(x, 0.0)
    x_max = jnp.max(x, axis=(2, 3), keepdims=True)
    return jnp.minimum(x, x_max * delta)


if __name__ == "__main__":
    key = jax.random.PRNGKey(0)
    B, C, H, W = 2, 4, 16, 16
    delta = 0.55  # suppression controller (module's __init__ arg)

    x = jax.random.normal(key, (B, C, H, W), dtype=jnp.float32)

    out = drs(x, delta)
    out = jax.block_until_ready(out)

    ref = drs_ref(x, delta)
    assert out.shape == (B, C, H, W)
    assert out.dtype == x.dtype
    assert jnp.allclose(out, ref, atol=1e-6, rtol=1e-6), "mismatch vs reference"

    # Also exercise a non-128-multiple spatial map and a ragged row grid.
    x3 = jax.random.normal(jax.random.PRNGKey(1), (3, 5, 7, 7), dtype=jnp.float32)
    out3 = jax.block_until_ready(drs(x3, delta))
    assert jnp.allclose(out3, drs_ref(x3, delta), atol=1e-6, rtol=1e-6)

    print("KERNEL_OK")
</pallas_src>

<mosaic_0001>
module attributes {stable_mosaic.version = 11 : i64} {
  func.func @_drs_kernel(%arg0: i32, %arg1: memref<1xf32, #tpu.memory_space<smem>>, %arg2: memref<8x256xf32, #tpu.memory_space<vmem>>, %arg3: memref<8x256xf32, #tpu.memory_space<vmem>>) attributes {dimension_semantics = [#tpu.dimension_semantics<parallel>], iteration_bounds = array<i64: 1>, scalar_prefetch = 0 : i64, scratch_operands = 0 : i64, tpu.core_type = #tpu.core_type<tc>, window_params = [{transform_indices = @transform_0, window_bounds = array<i64: 1>}, {transform_indices = @transform_1, window_bounds = array<i64: 8, 256>}, {transform_indices = @transform_2, window_bounds = array<i64: 8, 256>}]} {
    %c0 = arith.constant 0 : index
    %0 = memref.load %arg1[%c0] : memref<1xf32, #tpu.memory_space<smem>>
    %c0_0 = arith.constant 0 : index
    %c0_1 = arith.constant 0 : index
    %1 = vector.load %arg2[%c0_0, %c0_1] : memref<8x256xf32, #tpu.memory_space<vmem>>, vector<8x256xf32>
    %cst = arith.constant 0.000000e+00 : f32
    %2 = vector.broadcast %cst : f32 to vector<8x256xf32>
    %3 = arith.maximumf %1, %2 : vector<8x256xf32>
    %cst_2 = arith.constant dense<0xFF800000> : vector<8xf32>
    %4 = vector.multi_reduction <maximumf>, %3, %cst_2 [1] : vector<8x256xf32> to vector<8xf32>
    %5 = vector.shape_cast %4 : vector<8xf32> to vector<8x1xf32>
    %6 = vector.broadcast %0 : f32 to vector<8x1xf32>
    %7 = arith.mulf %5, %6 : vector<8x1xf32>
    %8 = vector.broadcast %7 : vector<8x1xf32> to vector<8x256xf32>
    %9 = arith.minimumf %3, %8 : vector<8x256xf32>
    %c0_3 = arith.constant 0 : index
    %c0_4 = arith.constant 0 : index
    %10 = vector.load %arg3[%c0_3, %c0_4] : memref<8x256xf32, #tpu.memory_space<vmem>>, vector<8x256xf32>
    tpu.vector_store %arg3[%c0_3, %c0_4], %9 {strides = array<i32>} : memref<8x256xf32, #tpu.memory_space<vmem>>, vector<8x256xf32>,
    return
  }
  func.func @transform_0(%arg0: i32) -> i32 {
    %c0_i32 = arith.constant 0 : i32
    %c0_i32_0 = arith.constant 0 : i32
    return %c0_i32 : i32
  }
  func.func @transform_1(%arg0: i32) -> (i32, i32) {
    %c0_i32 = arith.constant 0 : i32
    %c0_i32_0 = arith.constant 0 : i32
    return %arg0, %c0_i32 : i32, i32
  }
  func.func @transform_2(%arg0: i32) -> (i32, i32) {
    %c0_i32 = arith.constant 0 : i32
    %c0_i32_0 = arith.constant 0 : i32
    return %arg0, %c0_i32 : i32, i32
  }
}

</mosaic_0001>

<bundles_post_ra>
// kernel: tpu_custom_call.1
= control target key start
LH: loop header
LB: loop body
LE: loop exit
PB: predicated region body
PF: predicated region fallthrough
CT: control target
= control target key end

     0   :  { %8 = vsyncpa [#allocation4], 0  ;;  %s138_s0 = inlined_call_operand.<no memory space> [shape: f32[1], index: 0, kind: input, shape index: {}]   ;;  %s139_s1 = inlined_call_operand.hbm [shape: f32[8,256], index: 1, kind: input, shape index: {}]   ;;  %s140_s2 = inlined_call_operand.hbm [shape: f32[8,256], index: 2, kind: output, shape index: {}]  }
   0x1   :  { %9 = vsyncpa [#allocation5], 0  ;;  %s17_s11 = sshll.u32 %s139_s1, 4  ;;  %s112_s12 = smov [#allocation3]   ;;  %s18_s11 = int_to_ptr.hbm [resolvable:$true] %s17_s11 }
   0x2   :  { %s19_s13 = sshll.u32 %s112_s12, 4  ;;  %s20_s13 = int_to_ptr.vmem [resolvable:$true] %s19_s13 }
   0x3   :  { %22 = dma.hbm_to_vmem [thread:$0]  %s18_s11, 256, %s20_s13, [#allocation4]  }
   0x4   :  { %108 = dma.done.wait [#allocation4], 256  }
   0x5   :  { %109 = vsyncadd [#allocation4], 4294967040  ;;  %v28_v0 = vld [vmem:[#allocation3] sm:$0xff]  ;;  %v29_v1 = vld [vmem:[#allocation3 + $0x8] sm:$0xff]  ;;  %v35_v5 = vstv %s138_s0  ;;  %s113_s1 = smov [#allocation6]   ;;  %s48_s19 = sshll.u32 %s140_s2, 4  ;;  %s49_s19 = int_to_ptr.hbm [resolvable:$true] %s48_s19 }
   0x6   :  { %v30_v2 = vmax.f32 %v28_v0, 0.0  ;;  %v31_v3 = vmax.f32 %v29_v1, 0.0  ;;  %s46_s16 = sshll.u32 %s113_s1, 4  ;;  %s47_s16 = int_to_ptr.vmem [resolvable:$true] %s46_s16 }
   0x8   :  { %v32_v4 = vmax.f32 %v30_v2, %v31_v3 }
   0xa   :  { %33 = vmax.xlane.f32.xlu0 %v32_v4 }
  0x7d   :  { %v34_v6 = vpop.xlane.xlu0 %33 }
  0x7e   :  { %v36_v7 = vmul.f32 %v35_v5, %v34_v6 }
  0x80   :  { %v37_v8 = vmin.f32 %v30_v2, %v36_v7  ;;  %v38_v9 = vmin.f32 %v31_v3, %v36_v7 }
  0x82   :  { %39 = vst [vmem:[#allocation6] sm:$0xff] %v37_v8 }
  0x83   :  { %40 = vst [vmem:[#allocation6 + $0x8] sm:$0xff] %v38_v9 }
  0x84   :  { %51 = dma.vmem_to_hbm [thread:$0]  %s47_s16, 256, %s49_s19, [#allocation5]  }
  0x85   :  { %110 = dma.done.wait [#allocation5], 256  }
  0x86   :  { %111 = vsyncadd [#allocation5], 4294967040 }
  0x87   :  { %56 = vsyncpa [#allocation4], 1 }
  0x88   :  { %57 = vsyncpa [#allocation5], 1 }

</bundles_post_ra>
